<compile_context>
chip_gen: v7x
topology: tpu7x:2x2x1
jax: 0.10.0
libtpu: 0.0.40
codegen_flags: <defaults>
</compile_context>

<pallas_src>
import functools

import jax
import jax.numpy as jnp
from jax.experimental import pallas as pl
from jax.experimental.pallas import tpu as pltpu


_EPS_ALPHA = 1e-6
_EPS_LOG = 1e-5


# ----------------------------------------------------------------------------
# Math helpers (in-kernel)
# ----------------------------------------------------------------------------
def _digamma_ge1(x):
    """Digamma for x >= 1 (guaranteed at every call site).

    psi(x) = psi(x+5) - sum_{i=0..4} 1/(x+i), and the shift sum is evaluated
    as one rational p'(x)/p(x) with p(x) = x(x+1)(x+2)(x+3)(x+4); psi(x+5) is
    the asymptotic series through 1/(240 y^8) (truncation error < 2e-10 at
    y = 6).  Two *independent* reciprocals + ~10 FMAs instead of six dependent
    divides.  For huge x, p(x) overflow degrades gracefully (shift -> 0, which
    is also the true limit).
    """
    u = x * (x + 5.0)                                   # x^2 + 5x
    p = x * (u * (u + 10.0) + 24.0)                     # x(x+1)...(x+4)
    dp = 24.0 + x * (100.0 + x * (105.0 + x * (40.0 + 5.0 * x)))   # p'(x)
    y = x + 5.0
    inv_p = 1.0 / p                                     # EUP divide #1
    inv_y = 1.0 / y                                     # EUP divide #2 (indep.)
    shift = dp * inv_p                                  # sum_{i=0..4} 1/(x+i)
    inv2 = inv_y * inv_y
    series = inv2 * ((1.0 / 12.0)
                     - inv2 * ((1.0 / 120.0)
                               - inv2 * ((1.0 / 252.0)
                                         - inv2 * (1.0 / 240.0))))
    return jnp.log(y) - 0.5 * inv_y - series - shift


def _dist_u_epilogue(logits, o_ref):
    """logits (TB, K) -> distributional uncertainty (TB, 1)."""
    alpha = jnp.exp(logits) + _EPS_ALPHA                 # Dirichlet concentrations
    alpha0 = jnp.sum(alpha, axis=-1, keepdims=True)      # (TB, 1)

    inv_a0 = 1.0 / alpha0                                # one divide per row
    probs = alpha * inv_a0                               # (TB, K)

    psi_a = _digamma_ge1(alpha + 1.0)                    # (TB, K)
    psi_a0 = _digamma_ge1(alpha0 + 1.0)                  # (TB, 1)

    # total_uncertainty - exp_data_uncertainty, fused into one row reduction
    # (uses sum(probs) == 1):
    dist_u = jnp.sum(probs * (psi_a - jnp.log(probs + _EPS_LOG)),
                     axis=-1, keepdims=True) - psi_a0    # (TB, 1)
    o_ref[...] = dist_u.astype(o_ref.dtype)


# ----------------------------------------------------------------------------
# Kernels
# ----------------------------------------------------------------------------
def _dist_u_kernel_fused(x_ref, w_ref, b_ref, o_ref, *, mxu_dtype):
    """TK == D: single MXU pass per batch tile, no accumulator scratch."""
    x = x_ref[...]
    w = w_ref[...]
    if mxu_dtype is not None:                   # optional bf16 MXU feed
        x = x.astype(mxu_dtype)
        w = w.astype(mxu_dtype)
    logits = (jnp.dot(x, w, preferred_element_type=jnp.float32)
              + b_ref[...].astype(jnp.float32))
    _dist_u_epilogue(logits, o_ref)


def _dist_u_kernel_reduce(x_ref, w_ref, b_ref, o_ref, acc_ref, *,
                          mxu_dtype, d_total, tk):
    """Grid = (batch tiles ["parallel"], D-reduction tiles ["arbitrary"])."""
    k = pl.program_id(1)

    @pl.when(k == 0)
    def _():
        acc_ref[...] = jnp.zeros_like(acc_ref)

    x = x_ref[...]
    w = w_ref[...]
    if d_total % tk != 0:
        # Tail reduction block reads past D: the out-of-bounds VMEM region is
        # stale garbage (possibly inf/NaN), so zero BOTH operands there before
        # it can contaminate the accumulator (garbage * 0 would still be NaN).
        base = k * tk
        col = base + jax.lax.broadcasted_iota(jnp.int32, x.shape, 1)
        x = jnp.where(col < d_total, x, 0)
        row = base + jax.lax.broadcasted_iota(jnp.int32, w.shape, 0)
        w = jnp.where(row < d_total, w, 0)
    if mxu_dtype is not None:
        x = x.astype(mxu_dtype)
        w = w.astype(mxu_dtype)

    acc_ref[...] += jnp.dot(x, w, preferred_element_type=jnp.float32)

    @pl.when(k == pl.num_programs(1) - 1)
    def _():
        _dist_u_epilogue(acc_ref[...] + b_ref[...].astype(jnp.float32), o_ref)


# ----------------------------------------------------------------------------
# Generation-aware tile selection
# ----------------------------------------------------------------------------
def _chip_params():
    """(VMEM budget bytes, #TensorCores sharing the grid) for this chip."""
    try:
        vmem = int(pltpu.get_tpu_info().vmem_capacity_bytes)
    except Exception:
        vmem = 128 * 1024 * 1024                # assume v5e/v6e class
    # ~48 MiB of v7x's 64 MiB physical, ~100 MiB of v5e/v6e's 128 MiB.
    budget = min(int(vmem * 0.78), 100 * 1024 * 1024)
    num_cores = 2 if vmem <= 64 * 1024 * 1024 else 1     # v7x: 2 TCs/chip
    return budget, num_cores


def _round_up(v, m):
    return -(-v // m) * m


def _select_tiles(B, D, K, itemsize, budget, num_cores, tb, tk):
    kp = _round_up(K, 128)                       # lane-padded width in VMEM

    def fits(tb_, tk_):
        x_buf = 2 * tb_ * tk_ * itemsize         # double-buffered X tile
        w_buf = 2 * tk_ * kp * 4                 # W chunk (conservative f32)
        acc = tb_ * kp * 4                       # accumulator scratch
        out = 2 * tb_ * kp * 4                   # output blocks (lane-padded)
        slack = 2 * 1024 * 1024                  # bias / sems / compiler scratch
        return x_buf + w_buf + acc + out + slack <= budget

    # ---- batch tile --------------------------------------------------------
    if tb is not None:
        TB = B if tb >= B else max(8, (min(tb, B) // 8) * 8)
    elif B <= 8:
        TB = B
    else:
        # keep >= num_cores batch tiles so the "parallel" axis feeds every TC
        target = -(-B // num_cores)
        TB = min(2048, target)
        if TB != B:
            TB = _round_up(TB, 8)

    # ---- feature (reduction) tile ------------------------------------------
    if tk is not None:
        TK = D if tk >= D else max(128, (min(tk, D) // 128) * 128)
    else:
        while True:
            if fits(TB, D):
                TK = D                           # whole reduction, fused kernel
                break
            TK = 2048
            while TK > 128 and not fits(TB, TK):
                TK //= 2
            if fits(TB, TK) or TB <= 8:
                break
            TB = max(8, _round_up(TB // 2, 8))   # shrink batch tile, retry
    return TB, TK


# ----------------------------------------------------------------------------
# Wrapper
# ----------------------------------------------------------------------------
def dist_u_predictor(x, w, b, *, tb=None, tk=None, mxu_dtype=None):
    """DistUPredictor forward: distributional uncertainty, shape (B, 1).

    base_detector is a deterministic evidential head:
        alpha = exp(X @ W + b) + 1e-6.
    mxu_dtype=jnp.bfloat16 feeds the MXU in bf16 (f32 accumulation kept).
    """
    B, D = x.shape
    Dw, K = w.shape
    assert D == Dw, (D, Dw)
    b = jnp.asarray(b).reshape(1, K)

    budget, num_cores = _chip_params()
    itemsize = jnp.dtype(x.dtype).itemsize
    TB, TK = _select_tiles(B, D, K, itemsize, budget, num_cores, tb, tk)

    nb = pl.cdiv(B, TB)      # no host-side pad: the tail tile reads past B and
    nk = pl.cdiv(D, TK)      # its garbage rows are dropped by the masked store

    cost = pl.CostEstimate(
        flops=2 * B * D * K,
        transcendentals=B * K * 6,               # exp, 2 logs, ~3 recips / elem
        bytes_accessed=(B * D + D * K + K) * itemsize + B * 4,
    )

    if nk == 1 and TK == D:
        # ---- fused path: no reduction axis, no accumulator scratch ----------
        kernel = functools.partial(_dist_u_kernel_fused, mxu_dtype=mxu_dtype)
        grid_spec = pltpu.PrefetchScalarGridSpec(
            num_scalar_prefetch=0,
            grid=(nb,),
            in_specs=[
                pl.BlockSpec((TB, D), lambda i: (i, 0)),   # X tile (streamed)
                pl.BlockSpec((D, K), lambda i: (0, 0)),    # W (resident, 1 DMA)
                pl.BlockSpec((1, K), lambda i: (0, 0)),    # bias (resident)
            ],
            out_specs=pl.BlockSpec((TB, 1), lambda i: (i, 0)),
        )
        dims = ("parallel",)
    else:
        # ---- reduction path: VMEM accumulator, reduction axis last ----------
        kernel = functools.partial(_dist_u_kernel_reduce, mxu_dtype=mxu_dtype,
                                   d_total=D, tk=TK)
        grid_spec = pltpu.PrefetchScalarGridSpec(
            num_scalar_prefetch=0,
            grid=(nb, nk),
            in_specs=[
                pl.BlockSpec((TB, TK), lambda i, k: (i, k)),   # X tile
                pl.BlockSpec((TK, K), lambda i, k: (k, 0)),    # W chunk
                pl.BlockSpec((1, K), lambda i, k: (0, 0)),     # bias (resident)
            ],
            out_specs=pl.BlockSpec((TB, 1), lambda i, k: (i, 0)),
            scratch_shapes=[pltpu.VMEM((TB, K), jnp.float32)],
        )
        dims = ("parallel", "arbitrary")

    out = pl.pallas_call(
        kernel,
        out_shape=jax.ShapeDtypeStruct((B, 1), jnp.float32),
        grid_spec=grid_spec,
        compiler_params=pltpu.CompilerParams(
            dimension_semantics=dims,
            vmem_limit_bytes=budget,
        ),
        cost_estimate=cost,
    )(x, w, b)
    return out


# ----------------------------------------------------------------------------
# Plain-JAX reference mirroring the PyTorch forward exactly
# ----------------------------------------------------------------------------
def _reference(x, w, b, mxu_dtype=None):
    eps = 1e-6
    dt = mxu_dtype if mxu_dtype is not None else jnp.float32
    logits = (jnp.dot(x.astype(dt), w.astype(dt),
                      preferred_element_type=jnp.float32)
              + b.reshape(1, -1).astype(jnp.float32))
    alpha = jnp.exp(logits) + eps
    alpha0 = alpha.sum(-1)
    probs = alpha / alpha0[:, None]
    total_u = -jnp.sum(probs * jnp.log(probs + 1e-5), axis=1)
    dg = (jax.scipy.special.digamma(alpha + 1.0)
          - jax.scipy.special.digamma(alpha0[:, None] + 1.0))
    exp_data_u = -jnp.sum(probs * dg, axis=1)
    return (total_u - exp_data_u)[:, None]


if __name__ == "__main__":
    key = jax.random.PRNGKey(0)
    kx, kw, kb, kx2, kw2, kx3, kw3 = jax.random.split(key, 7)
    K = 16

    # 1) Small demo: batch=8, 32 flattened features, 16 classes (fused path).
    B, D = 8, 32
    x = jax.random.normal(kx, (B, D), dtype=jnp.float32)
    w = 0.1 * jax.random.normal(kw, (D, K), dtype=jnp.float32)
    b = 0.05 * jax.random.normal(kb, (1, K), dtype=jnp.float32)
    out = jax.block_until_ready(dist_u_predictor(x, w, b))
    ref = _reference(x, w, b)
    assert out.shape == (B, 1), out.shape
    assert jnp.allclose(out, ref, atol=1e-4, rtol=1e-4), (out, ref)

    # 2) Larger batch, auto tiles, no host-side pad (B not a tile multiple).
    B2, D2 = 600, 1024
    x2 = jax.random.normal(kx2, (B2, D2), dtype=jnp.float32)
    w2 = 0.02 * jax.random.normal(kw2, (D2, K), dtype=jnp.float32)
    out2 = jax.block_until_ready(dist_u_predictor(x2, w2, b))
    ref2 = _reference(x2, w2, b)
    assert out2.shape == (B2, 1), out2.shape
    assert jnp.allclose(out2, ref2, atol=1e-3, rtol=1e-3), \
        float(jnp.max(jnp.abs(out2 - ref2)))

    # 3) Forced small tiles: exercises the k-reduction accumulator path and the
    #    partially out-of-bounds batch tail (600 % 128 != 0).
    out3 = jax.block_until_ready(dist_u_predictor(x2, w2, b, tb=128, tk=256))
    assert jnp.allclose(out3, ref2, atol=1e-3, rtol=1e-3), \
        float(jnp.max(jnp.abs(out3 - ref2)))

    # 4) Non-divisible reduction (D % TK != 0): exercises in-kernel tail masking.
    B4, D4 = 64, 1000
    x4 = jax.random.normal(kx3, (B4, D4), dtype=jnp.float32)
    w4 = 0.02 * jax.random.normal(kw3, (D4, K), dtype=jnp.float32)
    out4 = jax.block_until_ready(dist_u_predictor(x4, w4, b, tk=256))
    ref4 = _reference(x4, w4, b)
    assert jnp.allclose(out4, ref4, atol=1e-3, rtol=1e-3), \
        float(jnp.max(jnp.abs(out4 - ref4)))

    # 5) bf16 MXU feed (flag-gated), validated against a bf16-matmul reference.
    out5 = jax.block_until_ready(
        dist_u_predictor(x2, w2, b, mxu_dtype=jnp.bfloat16))
    ref5 = _reference(x2, w2, b, mxu_dtype=jnp.bfloat16)
    assert jnp.allclose(out5, ref5, atol=2e-3, rtol=2e-3), \
        float(jnp.max(jnp.abs(out5 - ref5)))

    print("KERNEL_OK")
</pallas_src>

<mosaic_0001>
module attributes {stable_mosaic.version = 11 : i64} {
  func.func @_dist_u_kernel_fused(%arg0: i32, %arg1: memref<8x32xf32, #tpu.memory_space<vmem>>, %arg2: memref<32x16xf32, #tpu.memory_space<vmem>>, %arg3: memref<1x16xf32, #tpu.memory_space<vmem>>, %arg4: memref<8x1xf32, #tpu.memory_space<vmem>>) attributes {dimension_semantics = [#tpu.dimension_semantics<parallel>], iteration_bounds = array<i64: 1>, scalar_prefetch = 0 : i64, scratch_operands = 0 : i64, tpu.core_type = #tpu.core_type<tc>, window_params = [{transform_indices = @transform_0, window_bounds = array<i64: 8, 32>}, {pipeline_mode = #tpu.pipeline_mode<synchronous>, transform_indices = @transform_1, window_bounds = array<i64: 32, 16>}, {pipeline_mode = #tpu.pipeline_mode<synchronous>, transform_indices = @transform_2, window_bounds = array<i64: 1, 16>}, {transform_indices = @transform_3, window_bounds = array<i64: 8, 1>}]} {
    %c0 = arith.constant 0 : index
    %c0_0 = arith.constant 0 : index
    %0 = vector.load %arg1[%c0, %c0_0] : memref<8x32xf32, #tpu.memory_space<vmem>>, vector<8x32xf32>
    %c0_1 = arith.constant 0 : index
    %c0_2 = arith.constant 0 : index
    %1 = vector.load %arg2[%c0_1, %c0_2] : memref<32x16xf32, #tpu.memory_space<vmem>>, vector<32x16xf32>
    %cst = arith.constant dense<0.000000e+00> : vector<8x16xf32>
    %2 = tpu.matmul %0, %1, %cst {dimension_numbers = #tpu.dot_dimension_numbers<[1], [0], [0], [1], [0, 0, 1, 1], [], []>} : vector<8x32xf32>, vector<32x16xf32>, vector<8x16xf32> -> vector<8x16xf32>
    %c0_3 = arith.constant 0 : index
    %c0_4 = arith.constant 0 : index
    %3 = vector.load %arg3[%c0_3, %c0_4] : memref<1x16xf32, #tpu.memory_space<vmem>>, vector<1x16xf32>
    %4 = vector.broadcast %3 : vector<1x16xf32> to vector<8x16xf32>
    %5 = arith.addf %2, %4 : vector<8x16xf32>
    %6 = math.exp %5 : vector<8x16xf32>
    %cst_5 = arith.constant 9.99999997E-7 : f32
    %7 = vector.broadcast %cst_5 : f32 to vector<8x16xf32>
    %8 = arith.addf %6, %7 : vector<8x16xf32>
    %cst_6 = arith.constant dense<0.000000e+00> : vector<8xf32>
    %9 = vector.multi_reduction <add>, %8, %cst_6 [1] : vector<8x16xf32> to vector<8xf32>
    %10 = vector.shape_cast %9 : vector<8xf32> to vector<8x1xf32>
    %cst_7 = arith.constant 1.000000e+00 : f32
    %11 = vector.broadcast %cst_7 : f32 to vector<8x1xf32>
    %12 = arith.divf %11, %10 : vector<8x1xf32>
    %13 = vector.broadcast %12 : vector<8x1xf32> to vector<8x16xf32>
    %14 = arith.mulf %8, %13 : vector<8x16xf32>
    %cst_8 = arith.constant 1.000000e+00 : f32
    %15 = vector.broadcast %cst_8 : f32 to vector<8x16xf32>
    %16 = arith.addf %8, %15 : vector<8x16xf32>
    %cst_9 = arith.constant 5.000000e+00 : f32
    %17 = vector.broadcast %cst_9 : f32 to vector<8x16xf32>
    %18 = arith.addf %16, %17 : vector<8x16xf32>
    %19 = arith.mulf %16, %18 : vector<8x16xf32>
    %cst_10 = arith.constant 1.000000e+01 : f32
    %20 = vector.broadcast %cst_10 : f32 to vector<8x16xf32>
    %21 = arith.addf %19, %20 : vector<8x16xf32>
    %22 = arith.mulf %19, %21 : vector<8x16xf32>
    %cst_11 = arith.constant 2.400000e+01 : f32
    %23 = vector.broadcast %cst_11 : f32 to vector<8x16xf32>
    %24 = arith.addf %22, %23 : vector<8x16xf32>
    %25 = arith.mulf %16, %24 : vector<8x16xf32>
    %cst_12 = arith.constant 5.000000e+00 : f32
    %26 = vector.broadcast %cst_12 : f32 to vector<8x16xf32>
    %27 = arith.mulf %26, %16 : vector<8x16xf32>
    %cst_13 = arith.constant 4.000000e+01 : f32
    %28 = vector.broadcast %cst_13 : f32 to vector<8x16xf32>
    %29 = arith.addf %28, %27 : vector<8x16xf32>
    %30 = arith.mulf %16, %29 : vector<8x16xf32>
    %cst_14 = arith.constant 1.050000e+02 : f32
    %31 = vector.broadcast %cst_14 : f32 to vector<8x16xf32>
    %32 = arith.addf %31, %30 : vector<8x16xf32>
    %33 = arith.mulf %16, %32 : vector<8x16xf32>
    %cst_15 = arith.constant 1.000000e+02 : f32
    %34 = vector.broadcast %cst_15 : f32 to vector<8x16xf32>
    %35 = arith.addf %34, %33 : vector<8x16xf32>
    %36 = arith.mulf %16, %35 : vector<8x16xf32>
    %cst_16 = arith.constant 2.400000e+01 : f32
    %37 = vector.broadcast %cst_16 : f32 to vector<8x16xf32>
    %38 = arith.addf %37, %36 : vector<8x16xf32>
    %cst_17 = arith.constant 5.000000e+00 : f32
    %39 = vector.broadcast %cst_17 : f32 to vector<8x16xf32>
    %40 = arith.addf %16, %39 : vector<8x16xf32>
    %cst_18 = arith.constant 1.000000e+00 : f32
    %41 = vector.broadcast %cst_18 : f32 to vector<8x16xf32>
    %42 = arith.divf %41, %25 : vector<8x16xf32>
    %cst_19 = arith.constant 1.000000e+00 : f32
    %43 = vector.broadcast %cst_19 : f32 to vector<8x16xf32>
    %44 = arith.divf %43, %40 : vector<8x16xf32>
    %45 = arith.mulf %38, %42 : vector<8x16xf32>
    %46 = arith.mulf %44, %44 : vector<8x16xf32>
    %cst_20 = arith.constant 0.00416666688 : f32
    %47 = vector.broadcast %cst_20 : f32 to vector<8x16xf32>
    %48 = arith.mulf %46, %47 : vector<8x16xf32>
    %cst_21 = arith.constant 0.0039682542 : f32
    %49 = vector.broadcast %cst_21 : f32 to vector<8x16xf32>
    %50 = arith.subf %49, %48 : vector<8x16xf32>
    %51 = arith.mulf %46, %50 : vector<8x16xf32>
    %cst_22 = arith.constant 0.00833333377 : f32
    %52 = vector.broadcast %cst_22 : f32 to vector<8x16xf32>
    %53 = arith.subf %52, %51 : vector<8x16xf32>
    %54 = arith.mulf %46, %53 : vector<8x16xf32>
    %cst_23 = arith.constant 0.0833333358 : f32
    %55 = vector.broadcast %cst_23 : f32 to vector<8x16xf32>
    %56 = arith.subf %55, %54 : vector<8x16xf32>
    %57 = arith.mulf %46, %56 : vector<8x16xf32>
    %58 = math.log %40 : vector<8x16xf32>
    %cst_24 = arith.constant 5.000000e-01 : f32
    %59 = vector.broadcast %cst_24 : f32 to vector<8x16xf32>
    %60 = arith.mulf %59, %44 : vector<8x16xf32>
    %61 = arith.subf %58, %60 : vector<8x16xf32>
    %62 = arith.subf %61, %57 : vector<8x16xf32>
    %63 = arith.subf %62, %45 : vector<8x16xf32>
    %cst_25 = arith.constant 1.000000e+00 : f32
    %64 = vector.broadcast %cst_25 : f32 to vector<8x1xf32>
    %65 = arith.addf %10, %64 : vector<8x1xf32>
    %cst_26 = arith.constant 5.000000e+00 : f32
    %66 = vector.broadcast %cst_26 : f32 to vector<8x1xf32>
    %67 = arith.addf %65, %66 : vector<8x1xf32>
    %68 = arith.mulf %65, %67 : vector<8x1xf32>
    %cst_27 = arith.constant 1.000000e+01 : f32
    %69 = vector.broadcast %cst_27 : f32 to vector<8x1xf32>
    %70 = arith.addf %68, %69 : vector<8x1xf32>
    %71 = arith.mulf %68, %70 : vector<8x1xf32>
    %cst_28 = arith.constant 2.400000e+01 : f32
    %72 = vector.broadcast %cst_28 : f32 to vector<8x1xf32>
    %73 = arith.addf %71, %72 : vector<8x1xf32>
    %74 = arith.mulf %65, %73 : vector<8x1xf32>
    %cst_29 = arith.constant 5.000000e+00 : f32
    %75 = vector.broadcast %cst_29 : f32 to vector<8x1xf32>
    %76 = arith.mulf %75, %65 : vector<8x1xf32>
    %cst_30 = arith.constant 4.000000e+01 : f32
    %77 = vector.broadcast %cst_30 : f32 to vector<8x1xf32>
    %78 = arith.addf %77, %76 : vector<8x1xf32>
    %79 = arith.mulf %65, %78 : vector<8x1xf32>
    %cst_31 = arith.constant 1.050000e+02 : f32
    %80 = vector.broadcast %cst_31 : f32 to vector<8x1xf32>
    %81 = arith.addf %80, %79 : vector<8x1xf32>
    %82 = arith.mulf %65, %81 : vector<8x1xf32>
    %cst_32 = arith.constant 1.000000e+02 : f32
    %83 = vector.broadcast %cst_32 : f32 to vector<8x1xf32>
    %84 = arith.addf %83, %82 : vector<8x1xf32>
    %85 = arith.mulf %65, %84 : vector<8x1xf32>
    %cst_33 = arith.constant 2.400000e+01 : f32
    %86 = vector.broadcast %cst_33 : f32 to vector<8x1xf32>
    %87 = arith.addf %86, %85 : vector<8x1xf32>
    %cst_34 = arith.constant 5.000000e+00 : f32
    %88 = vector.broadcast %cst_34 : f32 to vector<8x1xf32>
    %89 = arith.addf %65, %88 : vector<8x1xf32>
    %cst_35 = arith.constant 1.000000e+00 : f32
    %90 = vector.broadcast %cst_35 : f32 to vector<8x1xf32>
    %91 = arith.divf %90, %74 : vector<8x1xf32>
    %cst_36 = arith.constant 1.000000e+00 : f32
    %92 = vector.broadcast %cst_36 : f32 to vector<8x1xf32>
    %93 = arith.divf %92, %89 : vector<8x1xf32>
    %94 = arith.mulf %87, %91 : vector<8x1xf32>
    %95 = arith.mulf %93, %93 : vector<8x1xf32>
    %cst_37 = arith.constant 0.00416666688 : f32
    %96 = vector.broadcast %cst_37 : f32 to vector<8x1xf32>
    %97 = arith.mulf %95, %96 : vector<8x1xf32>
    %cst_38 = arith.constant 0.0039682542 : f32
    %98 = vector.broadcast %cst_38 : f32 to vector<8x1xf32>
    %99 = arith.subf %98, %97 : vector<8x1xf32>
    %100 = arith.mulf %95, %99 : vector<8x1xf32>
    %cst_39 = arith.constant 0.00833333377 : f32
    %101 = vector.broadcast %cst_39 : f32 to vector<8x1xf32>
    %102 = arith.subf %101, %100 : vector<8x1xf32>
    %103 = arith.mulf %95, %102 : vector<8x1xf32>
    %cst_40 = arith.constant 0.0833333358 : f32
    %104 = vector.broadcast %cst_40 : f32 to vector<8x1xf32>
    %105 = arith.subf %104, %103 : vector<8x1xf32>
    %106 = arith.mulf %95, %105 : vector<8x1xf32>
    %107 = math.log %89 : vector<8x1xf32>
    %cst_41 = arith.constant 5.000000e-01 : f32
    %108 = vector.broadcast %cst_41 : f32 to vector<8x1xf32>
    %109 = arith.mulf %108, %93 : vector<8x1xf32>
    %110 = arith.subf %107, %109 : vector<8x1xf32>
    %111 = arith.subf %110, %106 : vector<8x1xf32>
    %112 = arith.subf %111, %94 : vector<8x1xf32>
    %cst_42 = arith.constant 9.99999974E-6 : f32
    %113 = vector.broadcast %cst_42 : f32 to vector<8x16xf32>
    %114 = arith.addf %14, %113 : vector<8x16xf32>
    %115 = math.log %114 : vector<8x16xf32>
    %116 = arith.subf %63, %115 : vector<8x16xf32>
    %117 = arith.mulf %14, %116 : vector<8x16xf32>
    %cst_43 = arith.constant dense<0.000000e+00> : vector<8xf32>
    %118 = vector.multi_reduction <add>, %117, %cst_43 [1] : vector<8x16xf32> to vector<8xf32>
    %119 = vector.shape_cast %118 : vector<8xf32> to vector<8x1xf32>
    %120 = arith.subf %119, %112 : vector<8x1xf32>
    %c0_44 = arith.constant 0 : index
    %c0_45 = arith.constant 0 : index
    %121 = vector.load %arg4[%c0_44, %c0_45] : memref<8x1xf32, #tpu.memory_space<vmem>>, vector<8x1xf32>
    tpu.vector_store %arg4[%c0_44, %c0_45], %120 {strides = array<i32>} : memref<8x1xf32, #tpu.memory_space<vmem>>, vector<8x1xf32>,
    return
  }
  func.func @transform_0(%arg0: i32) -> (i32, i32) {
    %c0_i32 = arith.constant 0 : i32
    %c0_i32_0 = arith.constant 0 : i32
    return %arg0, %c0_i32 : i32, i32
  }
  func.func @transform_1(%arg0: i32) -> (i32, i32) {
    %c0_i32 = arith.constant 0 : i32
    %c0_i32_0 = arith.constant 0 : i32
    %c0_i32_1 = arith.constant 0 : i32
    return %c0_i32, %c0_i32_0 : i32, i32
  }
  func.func @transform_2(%arg0: i32) -> (i32, i32) {
    %c0_i32 = arith.constant 0 : i32
    %c0_i32_0 = arith.constant 0 : i32
    %c0_i32_1 = arith.constant 0 : i32
    return %c0_i32, %c0_i32_0 : i32, i32
  }
  func.func @transform_3(%arg0: i32) -> (i32, i32) {
    %c0_i32 = arith.constant 0 : i32
    %c0_i32_0 = arith.constant 0 : i32
    return %arg0, %c0_i32 : i32, i32
  }
}

</mosaic_0001>

<bundles_post_ra>
// kernel: tpu_custom_call.1
= control target key start
LH: loop header
LB: loop body
LE: loop exit
PB: predicated region body
PF: predicated region fallthrough
CT: control target
= control target key end

     0   :  { %8 = vsyncpa [#allocation3], 0  ;;  %s467_s0 = inlined_call_operand.hbm [shape: f32[8,32], index: 0, kind: input, shape index: {}]   ;;  %s468_s1 = inlined_call_operand.hbm [shape: f32[32,16], index: 1, kind: input, shape index: {}]   ;;  %s469_s2 = inlined_call_operand.hbm [shape: f32[1,16], index: 2, kind: input, shape index: {}]   ;;  %s470_s3 = inlined_call_operand.hbm [shape: f32[8,1], index: 3, kind: output, shape index: {}]  }
   0x1   :  { %9 = vsyncpa [#allocation6], 0 }
   0x2   :  { %10 = vsyncpa [#allocation4], 0  ;;  %s388_s12 = smov [#allocation5]   ;;  %s294_s16 = scalar_lea.hbm %s468_s1, 512 }
   0x3   :  { %s26_s13 = sshll.u32 %s388_s12, 4  ;;  %p295_p0 = scmp.ne.s32.totalorder %s468_s1, %s294_s16  ;;  %s27_s13 = int_to_ptr.vmem [resolvable:$true] %s26_s13 }
   0x4   :  { %p298_p1 = scmp.lt.u32.totalorder %s294_s16, %s468_s1 }
   0x6   :  { %p300_p2 = pnand %p298_p1, %p295_p0 }
   0x8   :  { %303 = shalt.err (!%p300_p2)
}
   0x9   :  { %s304_s21 = scalar_lea.vmem %s27_s13, 512  ;;  %p309_p4 = scmp.lt.s32.totalorder %s27_s13, %s27_s13 }
   0xa   :  { %p305_p3 = scmp.ne.s32.totalorder %s27_s13, %s304_s21  ;;  %p310_p5 = scmp.lt.s32.totalorder %s304_s21, %s304_s21 }
   0xc   :  { %p311_p6 = por %p310_p5, %p309_p4 }
   0xe   :  { %p312_p7 = pnand %p311_p6, %p305_p3 }
  0x10   :  { %315 = shalt.err (!%p312_p7)
}
  0x11   :  { %s389_s22 = smov 128   ;;  %s390_s23 = smov 8  }
  0x12   :  { %32 = dma.hbm_to_vmem [thread:$0]  %s468_s1, 512, %s27_s13, [#allocation6], %s389_s22, %s389_s22, %s390_s23  }
  0x13   :  { %s391_s26 = smov [#allocation2]   ;;  %s392_s28 = smov [#allocation7]  }
  0x14   :  { %s17_s27 = sshll.u32 %s391_s26, 4  ;;  %s39_s29 = sshll.u32 %s392_s28, 4  ;;  %s18_s27 = int_to_ptr.vmem [resolvable:$true] %s17_s27  ;;  %s40_s29 = int_to_ptr.vmem [resolvable:$true] %s39_s29 }
  0x15   :  { %s316_s5 = scalar_lea.hbm %s467_s0, 128 }
  0x16   :  { %p317_p8 = scmp.ne.s32.totalorder %s467_s0, %s316_s5  ;;  %p320_p9 = scmp.lt.u32.totalorder %s316_s5, %s467_s0 }
  0x18   :  { %p322_p10 = pnand %p320_p9, %p317_p8 }
  0x1a   :  { %325 = shalt.err (!%p322_p10)
}
  0x1b   :  { %s326_s1 = scalar_lea.vmem %s18_s27, 128  ;;  %p331_p12 = scmp.lt.s32.totalorder %s18_s27, %s18_s27 }
  0x1c   :  { %p327_p11 = scmp.ne.s32.totalorder %s18_s27, %s326_s1  ;;  %p332_p13 = scmp.lt.s32.totalorder %s326_s1, %s326_s1 }
  0x1e   :  { %p333_p0 = por %p332_p13, %p331_p12 }
  0x20   :  { %p334_p1 = pnand %p333_p0, %p327_p11 }
  0x22   :  { %337 = shalt.err (!%p334_p1)
}
  0x23   :  { %20 = dma.hbm_to_vmem [thread:$0]  %s467_s0, 128, %s18_s27, [#allocation3]  }
  0x24   :  { %s338_s14 = scalar_lea.hbm %s469_s2, 16 }
  0x25   :  { %p339_p2 = scmp.ne.s32.totalorder %s469_s2, %s338_s14  ;;  %p342_p3 = scmp.lt.u32.totalorder %s338_s14, %s469_s2 }
  0x27   :  { %p344_p4 = pnand %p342_p3, %p339_p2 }
  0x29   :  { %347 = shalt.err (!%p344_p4)
}
  0x2a   :  { %s348_s19 = scalar_lea.vmem %s40_s29, 16  ;;  %s352_s20 = scalar_lea.vmem %s40_s29, 32 }
  0x2b   :  { %p349_p5 = scmp.ne.s32.totalorder %s40_s29, %s348_s19  ;;  %p353_p6 = scmp.lt.s32.totalorder %s40_s29, %s40_s29 }
  0x2c   :  { %p354_p7 = scmp.lt.s32.totalorder %s352_s20, %s348_s19 }
  0x2e   :  { %p355_p8 = por %p354_p7, %p353_p6 }
  0x30   :  { %p356_p9 = pnand %p355_p8, %p349_p5 }
  0x32   :  { %359 = shalt.err (!%p356_p9)
}
  0x33   :  { %42 = dma.hbm_to_vmem [thread:$0]  %s469_s2, 16, %s40_s29, [#allocation6]  }
  0x34   :  { %382 = dma.done.wait [#allocation3], 128  }
  0x35   :  { %383 = vsyncadd [#allocation3], 4294967168 }
  0x36   :  { %384 = dma.done.wait [#allocation6], 528  }
  0x37   :  { %385 = vsyncadd [#allocation6], 4294966768  ;;  %v393_v0 = vmov 0.0|0.0   ;;  %vm394_vm0 = vmmov 0   ;;  %v395_v1 = vmov 0.0   ;;  %v53_v2 = vld [vmem:[#allocation5] sm:$0xff] }
  0x38   :  { %261 = vmatprep.subr.bf16.mxu0 %v393_v0  ;;  %258 = vmatprep.mubr.msk.f32.mxu0 %vm394_vm0, %v395_v1  ;;  %v54_v3 = vld [vmem:[#allocation5 + $0x8] sm:$0xff]  ;;  %v55_v4 = vld [vmem:[#allocation5 + $0x10] sm:$0xff]  ;;  %v56_v6 = vld [vmem:[#allocation5 + $0x18] sm:$0xff]  ;;  %vm64_vm1 = vcmask 261120   ;;  %vm141_vm2 = vcmask 130048   ;;  %s396_s2 = smov [#allocation8]  }
  0x39   :  { %v262_v5 = vpack.c.bf16 %v54_v3, %v53_v2  ;;  %v265_v7 = vpack.c.bf16 %v56_v6, %v55_v4  ;;  %v52_v8 = vld [vmem:[#allocation2] sm:$0xff]  ;;  %v243_v9 = vld [vmem:[#allocation7] ss:$0 sm:$0xff]  ;;  %s233_s22 = sshll.u32 %s396_s2, 4  ;;  %vm225_vm3 = vcmask 7168   ;;  %s234_s22 = int_to_ptr.vmem [resolvable:$true] %s233_s22 }
  0x3a   :  { %s360_s23 = scalar_lea.vmem %s234_s22, 128  ;;  %p365_p11 = scmp.lt.s32.totalorder %s234_s22, %s234_s22 }
  0x3b   :  { %263 = vmatpush3.bf16.msra.mxu0 %v262_v5  ;;  %p361_p10 = scmp.ne.s32.totalorder %s234_s22, %s360_s23  ;;  %p366_p12 = scmp.lt.s32.totalorder %s360_s23, %s360_s23 }
  0x3c   :  { %264 = vmatprep.subr.bf16.mxu0 %v393_v0 }
  0x3d   :  { %p367_p13 = por %p366_p12, %p365_p11 }
  0x3f   :  { %266 = vmatpush3.bf16.msra.mxu0 %v265_v7  ;;  %p368_p0 = pnand %p367_p13, %p361_p10 }
  0x42   :  { %259 = vmatmul.mubr.msk.f32.vlgmr.msra.gmra.mrb[0].mxu0 %vm64_vm1, %v52_v8 }
 0x115   :  { %v134_v10 = vpop.f32.mrb[0].mxu0 }
 0x116   :  { %v135_v11 = vadd.f32 %v243_v9, %v134_v10  ;;  %v260_v12 = vpop.f32.mrb[1].mxu0 }
 0x118   :  { %v138_v13 = vmul.f32 1.442695, %v135_v11 }
 0x11a   :  { %276 = vpow2.f32 %v138_v13 }
 0x124   :  { %v277_v14 = vpop.eup %276 }
 0x125   :  { %v140_v15 = vadd.f32 1e-06, %v277_v14 }
 0x127   :  { %v142_v16 = vsel %vm141_vm2, %v140_v15, 0.0  ;;  %v148_v17 = vadd.f32 1.0, %v140_v15 }
 0x128   :  { %143 = vadd.xlane.f32.xlu0 %v142_v16 }
 0x129   :  { %v149_v18 = vadd.f32 5.0, %v148_v17  ;;  %v155_v22 = vmul.f32 5.0, %v148_v17 }
 0x12b   :  { %278 = vrcp.f32 %v149_v18  ;;  %v150_v21 = vmul.f32 %v149_v18, %v148_v17  ;;  %v156_v25 = vadd.f32 40.0, %v155_v22 }
 0x12d   :  { %v151_v24 = vadd.f32 10.0, %v150_v21  ;;  %v157_v29 = vmul.f32 %v156_v25, %v148_v17 }
 0x12f   :  { %v152_v28 = vmul.f32 %v151_v24, %v150_v21  ;;  %v158_v32 = vadd.f32 105.0, %v157_v29 }
 0x131   :  { %v153_v31 = vadd.f32 24.0, %v152_v28  ;;  %v159_v36 = vmul.f32 %v158_v32, %v148_v17 }
 0x133   :  { %v154_v34 = vmul.f32 %v153_v31, %v148_v17  ;;  %v160_v41 = vadd.f32 100.0, %v159_v36 }
 0x135   :  { %v279_v19 = vpop.eup %278  ;;  %v161_v45 = vmul.f32 %v160_v41, %v148_v17 }
 0x136   :  { %v168_v20 = vmul.f32 %v279_v19, %v279_v19  ;;  %v178_v44 = vmul.f32 0.5, %v279_v19 }
 0x137   :  { %v162_v49 = vadd.f32 24.0, %v161_v45 }
 0x138   :  { %v169_v23 = vmul.f32 0.004166667, %v168_v20 }
 0x13a   :  { %v170_v26 = vsub.f32 0.003968254, %v169_v23 }
 0x13c   :  { %v171_v30 = vmul.f32 %v170_v26, %v168_v20 }
 0x13e   :  { %v172_v33 = vsub.f32 0.008333334, %v171_v30 }
 0x140   :  { %v173_v37 = vmul.f32 %v172_v33, %v168_v20 }
 0x142   :  { %v174_v42 = vsub.f32 0.083333336, %v173_v37 }
 0x144   :  { %v175_v46 = vmul.f32 %v174_v42, %v168_v20 }
 0x1b5   :  { %v144_v27 = vpop.xlane.xlu0 %143 }
 0x1b6   :  { %280 = vrcp.f32 %v144_v27  ;;  %v182_v58 = vadd.f32 1.0, %v144_v27 }
 0x1b7   :  { %282 = vlog2.f32 %v149_v18 }
 0x1b8   :  { %284 = vrcp.f32 %v154_v34  ;;  %v183_v59 = vadd.f32 5.0, %v182_v58  ;;  %v189_v63 = vmul.f32 5.0, %v182_v58 }
 0x1ba   :  { %v184_v62 = vmul.f32 %v183_v59, %v182_v58  ;;  %v190_v2 = vadd.f32 40.0, %v189_v63 }
 0x1bc   :  { %v185_v1 = vadd.f32 10.0, %v184_v62  ;;  %v191_v5 = vmul.f32 %v190_v2, %v182_v58 }
 0x1be   :  { %v186_v4 = vmul.f32 %v185_v1, %v184_v62  ;;  %v192_v8 = vadd.f32 105.0, %v191_v5 }
 0x1c0   :  { %v281_v35 = vpop.eup %280  ;;  %v187_v7 = vadd.f32 24.0, %v186_v4  ;;  %v193_v11 = vmul.f32 %v192_v8, %v182_v58 }
 0x1c1   :  { %v147_v38 = vmul.f32 %v281_v35, %v140_v15  ;;  %v283_v39 = vpop.eup %282 }
 0x1c2   :  { %v177_v43 = vmul.f32 0.6931472, %v283_v39  ;;  %v285_v48 = vpop.eup %284  ;;  %v188_v10 = vmul.f32 %v187_v7, %v182_v58  ;;  %v194_v14 = vadd.f32 100.0, %v193_v11 }
 0x1c3   :  { %v216_v40 = vadd.f32 1e-05, %v147_v38  ;;  %v167_v51 = vmul.f32 %v285_v48, %v162_v49 }
 0x1c4   :  { %v179_v47 = vsub.f32 %v177_v43, %v178_v44  ;;  %v195_v18 = vmul.f32 %v194_v14, %v182_v58 }
 0x1c5   :  { %286 = vlog2.f32 %v216_v40 }
 0x1c6   :  { %v180_v50 = vsub.f32 %v179_v47, %v175_v46  ;;  %288 = vrcp.f32 %v183_v59  ;;  %v196_v22 = vadd.f32 24.0, %v195_v18 }
 0x1c7   :  { %290 = vlog2.f32 %v183_v59 }
 0x1c8   :  { %v181_v53 = vsub.f32 %v180_v50, %v167_v51  ;;  %292 = vrcp.f32 %v188_v10 }
 0x1cf   :  { %v287_v52 = vpop.eup %286 }
 0x1d0   :  { %v218_v54 = vmul.f32 0.6931472, %v287_v52  ;;  %v289_v60 = vpop.eup %288 }
 0x1d1   :  { %v202_v61 = vmul.f32 %v289_v60, %v289_v60  ;;  %v291_v13 = vpop.eup %290  ;;  %v212_v17 = vmul.f32 0.5, %v289_v60 }
 0x1d2   :  { %v219_v55 = vsub.f32 %v181_v53, %v218_v54  ;;  %v211_v16 = vmul.f32 0.6931472, %v291_v13  ;;  %v293_v21 = vpop.eup %292 }
 0x1d3   :  { %v203_v0 = vmul.f32 0.004166667, %v202_v61  ;;  %v201_v24 = vmul.f32 %v293_v21, %v196_v22 }
 0x1d4   :  { %v220_v56 = vmul.f32 %v219_v55, %v147_v38  ;;  %v213_v20 = vsub.f32 %v211_v16, %v212_v17 }
 0x1d5   :  { %v204_v3 = vsub.f32 0.003968254, %v203_v0 }
 0x1d6   :  { %v221_v57 = vsel %vm141_vm2, %v220_v56, 0.0 }
 0x1d7   :  { %222 = vadd.xlane.f32.xlu0 %v221_v57  ;;  %v205_v6 = vmul.f32 %v204_v3, %v202_v61 }
 0x1d9   :  { %v206_v9 = vsub.f32 0.008333334, %v205_v6 }
 0x1db   :  { %v207_v12 = vmul.f32 %v206_v9, %v202_v61 }
 0x1dd   :  { %v208_v15 = vsub.f32 0.083333336, %v207_v12 }
 0x1df   :  { %v209_v19 = vmul.f32 %v208_v15, %v202_v61 }
 0x1e1   :  { %v214_v23 = vsub.f32 %v213_v20, %v209_v19 }
 0x1e3   :  { %v215_v25 = vsub.f32 %v214_v23, %v201_v24 }
 0x264   :  { %v223_v26 = vpop.xlane.xlu0 %222 }
 0x265   :  { %v224_v27 = vsub.f32 %v223_v26, %v215_v25 }
 0x267   :  { %226 = vst.msk [vmem:[#allocation8] sm:$0xff] %vm225_vm3, %v224_v27 }
 0x268   :  { %371 = shalt.err (!%p368_p0)
}
 0x269   :  { %s372_s26 = scalar_lea.hbm %s470_s3, 128 }
 0x26a   :  { %p373_p1 = scmp.ne.s32.totalorder %s470_s3, %s372_s26  ;;  %p376_p2 = scmp.lt.u32.totalorder %s372_s26, %s470_s3 }
 0x26c   :  { %p378_p3 = pnand %p376_p2, %p373_p1 }
 0x26e   :  { %381 = shalt.err (!%p378_p3)
}
 0x26f   :  { %236 = dma.vmem_to_hbm [thread:$0]  %s234_s22, 128, %s470_s3, [#allocation4]  }
 0x270   :  { %386 = dma.done.wait [#allocation4], 128  }
 0x271   :  { %387 = vsyncadd [#allocation4], 4294967168 }
 0x272   :  { %240 = vsyncpa [#allocation3], 1 }
 0x273   :  { %241 = vsyncpa [#allocation6], 1 }
 0x274   :  { %242 = vsyncpa [#allocation4], 1 }

</bundles_post_ra>
